<compile_context>
chip_gen: v5e
topology: v5e:2x2
jax: 0.10.0
libtpu: 0.0.40
codegen_flags: <defaults>
</compile_context>

<pallas_src>
import jax
import jax.numpy as jnp
import numpy as np
from jax.experimental import pallas as pl
from jax.experimental.pallas import tpu as pltpu


# -----------------------------------------------------------------------------
# Fused Pallas kernel: Nonlocal(g-proj + W-conv + residual) -> conv1 -> conv2 -> Linear
# -----------------------------------------------------------------------------
def _glem_fused_kernel(x_ref,
                       wg_ref, bg_ref,
                       ww_ref, bw_ref,
                       w1_ref, b1_ref,
                       w2_ref, b2_ref,
                       wl_ref, bl_ref,
                       o_ref):
    """One M-tile of the whole GLEM head.

    x_ref : (tm, C)   f32   batch rows (N = H*W = 1 folded in), sublane-padded
    wg    : (C, C2)   bf16  Nonlocal g 1x1 conv;          bg : (1, C2) f32
    ww    : (C2, C)   bf16  Nonlocal W 1x1 conv, BN-folded; bw : (1, C)  f32
    w1/w2 : (C, C)    bf16  3x3-conv center taps, BN-folded; b1/b2 : (1, C) f32
    wl    : (C, NCP)  bf16  classifier (lane-padded);       bl : (1, NCP) f32
    o_ref : (tm, NCP) f32   lane-dense logits
    """
    x = x_ref[...]                                      # (tm, C) f32
    xb = x.astype(jnp.bfloat16)

    # ---- Nonlocal ----
    # N = H*W = 1  =>  softmax over a length-1 axis == 1 exactly  =>  y == g.
    g = jnp.dot(xb, wg_ref[...], preferred_element_type=jnp.float32) + bg_ref[...]
    # W[0] 1x1 conv with W[1] eval-mode BatchNorm folded in, plus the residual.
    z = (jnp.dot(g.astype(jnp.bfloat16), ww_ref[...],
                 preferred_element_type=jnp.float32) + bw_ref[...]) + x

    # ---- conv1 (3x3 pad=1 on a 1x1 map == center tap, BN folded) + relu ----
    a1 = jnp.maximum(
        jnp.dot(z.astype(jnp.bfloat16), w1_ref[...],
                preferred_element_type=jnp.float32) + b1_ref[...], 0.0)

    # ---- conv2 + relu ----
    a2 = jnp.maximum(
        jnp.dot(a1.astype(jnp.bfloat16), w2_ref[...],
                preferred_element_type=jnp.float32) + b2_ref[...], 0.0)

    # ---- Flatten (identity at H=W=1) + Linear, lane-dense padded logits ----
    o_ref[...] = (jnp.dot(a2.astype(jnp.bfloat16), wl_ref[...],
                          preferred_element_type=jnp.float32)
                  + bl_ref[...]).astype(o_ref.dtype)


# -----------------------------------------------------------------------------
# One-time parameter prep (OUTSIDE the per-call jit path)
# -----------------------------------------------------------------------------
def prepare_params(p, num_classes):
    """Fold eval-mode BN + biases into matmul weights, slice 3x3 center taps (valid only
    at H=W=1), cast MXU operands to bf16, and lane-pad the classifier — exactly once."""
    # Nonlocal W[] conv + BN:  (y@ww + bw)*wsc + wsh  ==  y @ (ww*wsc) + (bw*wsc + wsh)
    ww = p['ww'] * p['w_scale']
    bw = p['bw'] * p['w_scale'] + p['w_shift']
    # conv1/conv2: relu(((z@w + b) * s) + t) == relu(z @ (w*s) + (b*s + t))
    w1 = p['conv1_w'][1, 1] * p['bn1_scale']
    b1 = p['conv1_b'] * p['bn1_scale'] + p['bn1_shift']
    w2 = p['conv2_w'][1, 1] * p['bn2_scale']
    b2 = p['conv2_b'] * p['bn2_scale'] + p['bn2_shift']

    ncp = pl.cdiv(num_classes, 128) * 128               # lane-dense logits
    wl = jnp.pad(p['lin_w'], ((0, 0), (0, ncp - num_classes)))
    bl = jnp.pad(p['lin_b'], ((0, 0), (0, ncp - num_classes)))

    bf16 = lambda a: a.astype(jnp.bfloat16)              # MXU operands; f32 accumulation
    kp = dict(
        wg=bf16(p['wg']), bg=p['bg'].astype(jnp.float32),
        ww=bf16(ww), bw=bw.astype(jnp.float32),
        w1=bf16(w1), b1=b1.astype(jnp.float32),
        w2=bf16(w2), b2=b2.astype(jnp.float32),
        wl=bf16(wl), bl=bl.astype(jnp.float32),
        num_classes=int(num_classes),
    )
    # Force the prep computation now, not lazily inside the first forward.
    for k, v in kp.items():
        if isinstance(v, jnp.ndarray):
            kp[k] = jax.block_until_ready(v)
    return kp


# -----------------------------------------------------------------------------
# Forward builder: single fused pallas_call, weights resident across M-tiles
# -----------------------------------------------------------------------------
def build_glem_forward(kp):
    num_classes = kp['num_classes']
    weights = tuple(kp[k] for k in
                    ('wg', 'bg', 'ww', 'bw', 'w1', 'b1', 'w2', 'b2', 'wl', 'bl'))

    @jax.jit
    def _fwd(feat_nchw, *args_w):
        B, C, H, W = feat_nchw.shape
        # Center-tap conv + reshape-flatten are only valid for 1x1 feature maps.
        assert H == 1 and W == 1, "GLEM fused kernel requires a (B, C, 1, 1) feature map"

        ncp = args_w[-1].shape[1]
        # bf16 MXU operands pack 16 sublanes per vreg -> pad M to a multiple of 16.
        m0 = pl.cdiv(B, 16) * 16
        tm = 128 if m0 > 128 else m0                    # M-tile (parallel across v7x TCs)
        M = pl.cdiv(m0, tm) * tm

        x = feat_nchw.reshape(B, C).astype(jnp.float32)  # NCHW->NHWC == reshape at H=W=1
        x = jnp.pad(x, ((0, M - B), (0, 0)))

        # Weight blocks map to (0,0) for every grid step -> stay VMEM-resident (no re-DMA).
        in_specs = ([pl.BlockSpec((tm, C), lambda i: (i, 0))]
                    + [pl.BlockSpec(w.shape, lambda i: (0, 0)) for w in args_w])
        out_specs = pl.BlockSpec((tm, ncp), lambda i: (i, 0))

        # VMEM budget from the actual footprint (weights + double-buffered act tiles).
        weight_bytes = sum(int(w.size) * w.dtype.itemsize for w in args_w)
        act_bytes = tm * C * 4 + tm * ncp * 4
        vmem_limit = int(min(100 * 1024 * 1024,
                             2 * (weight_bytes + 2 * act_bytes) + (4 << 20)))

        C2 = args_w[0].shape[1]
        flops = 2 * M * (C * C2 + C2 * C + C * C + C * C + C * ncp)
        bytes_accessed = int(x.size) * 4 + weight_bytes + M * ncp * 4
        cost = pl.CostEstimate(flops=flops, transcendentals=0,
                               bytes_accessed=bytes_accessed)

        out = pl.pallas_call(
            _glem_fused_kernel,
            out_shape=jax.ShapeDtypeStruct((M, ncp), jnp.float32),
            grid=(M // tm,),
            in_specs=in_specs,
            out_specs=out_specs,
            compiler_params=pltpu.CompilerParams(
                dimension_semantics=("parallel",),
                vmem_limit_bytes=vmem_limit),
            cost_estimate=cost,
        )(x, *args_w)
        return out[:B, :num_classes]

    def fwd(feat_nchw):
        return _fwd(feat_nchw, *weights)

    return fwd


# -----------------------------------------------------------------------------
# Deterministic parameter init + pure-JAX f32 reference (full softmax, full 3x3 convs)
# -----------------------------------------------------------------------------
def _fold_bn(gamma, beta, mean, var, eps=1e-5):
    scale = gamma / jnp.sqrt(var + eps)
    shift = beta - mean * scale
    return scale[None, :], shift[None, :]


def init_params(key, C, num_classes):
    C2 = C // 2
    ks = jax.random.split(key, 24)
    rnd = lambda k, shape, s=0.05: (jax.random.normal(k, shape) * s).astype(jnp.float32)
    p = {}
    # Nonlocal 1x1 convs (torch [out,in,1,1] weights stored as [in,out] matmul matrices)
    p['wg'] = rnd(ks[0], (C, C2)); p['bg'] = rnd(ks[1], (1, C2))
    p['wt'] = rnd(ks[2], (C, C2)); p['bt'] = rnd(ks[3], (1, C2))
    p['wp'] = rnd(ks[4], (C, C2)); p['bp'] = rnd(ks[5], (1, C2))
    p['ww'] = rnd(ks[6], (C2, C)); p['bw'] = rnd(ks[7], (1, C))
    # W[1] BatchNorm: weight=1, bias=0 (nn.init.constant); random running stats, eval mode
    p['w_scale'], p['w_shift'] = _fold_bn(jnp.ones((C,), jnp.float32),
                                          jnp.zeros((C,), jnp.float32),
                                          rnd(ks[8], (C,)),
                                          jnp.abs(rnd(ks[9], (C,))) + 1.0)
    # conv1 / conv2 (torch [out,in,3,3] stored as HWIO [3,3,in,out]) + bn1 / bn2
    p['conv1_w'] = rnd(ks[10], (3, 3, C, C)); p['conv1_b'] = rnd(ks[11], (1, C))
    p['bn1_scale'], p['bn1_shift'] = _fold_bn(1.0 + rnd(ks[12], (C,)), rnd(ks[13], (C,)),
                                              rnd(ks[14], (C,)),
                                              jnp.abs(rnd(ks[15], (C,))) + 1.0)
    p['conv2_w'] = rnd(ks[16], (3, 3, C, C)); p['conv2_b'] = rnd(ks[17], (1, C))
    p['bn2_scale'], p['bn2_shift'] = _fold_bn(1.0 + rnd(ks[18], (C,)), rnd(ks[19], (C,)),
                                              rnd(ks[20], (C,)),
                                              jnp.abs(rnd(ks[21], (C,))) + 1.0)
    # final Linear (torch [num_classes, C] stored transposed)
    p['lin_w'] = rnd(ks[22], (C, num_classes)); p['lin_b'] = rnd(ks[23], (1, num_classes))
    return p


def reference_forward(feat_nchw, p):
    """Faithful f32 reference of the torch module (full softmax, full 3x3 convs, eval BN)."""
    x = jnp.transpose(feat_nchw, (0, 2, 3, 1)).astype(jnp.float32)
    B, H, W, C = x.shape
    xf = x.reshape(B, H * W, C)
    g = xf @ p['wg'] + p['bg']
    th = xf @ p['wt'] + p['bt']
    ph = xf @ p['wp'] + p['bp']
    a = jax.nn.softmax(jnp.einsum('bnc,bmc->bnm', th, ph), axis=-1)
    y = jnp.einsum('bnm,bmc->bnc', a, g)
    wy = (y @ p['ww'] + p['bw']) * p['w_scale'] + p['w_shift']
    z = (wy + xf).reshape(B, H, W, C)

    def conv_bn_relu(u, w, b, sc, sh):
        o = jax.lax.conv_general_dilated(u, w, (1, 1), 'SAME',
                                         dimension_numbers=('NHWC', 'HWIO', 'NHWC'))
        o = o + b.reshape(1, 1, 1, -1)
        o = o * sc.reshape(1, 1, 1, -1) + sh.reshape(1, 1, 1, -1)
        return jnp.maximum(o, 0.0)

    a1 = conv_bn_relu(z, p['conv1_w'], p['conv1_b'], p['bn1_scale'], p['bn1_shift'])
    a2 = conv_bn_relu(a1, p['conv2_w'], p['conv2_b'], p['bn2_scale'], p['bn2_shift'])
    flat = jnp.transpose(a2, (0, 3, 1, 2)).reshape(B, -1)
    return flat @ p['lin_w'] + p['lin_b']


if __name__ == "__main__":
    key = jax.random.PRNGKey(0)
    kf, kp_key = jax.random.split(key)
    # resnet backbone with children()[:-1] ends in global avg-pool -> feature is [B, C, 1, 1]
    B, C, H, W = 2, 64, 1, 1
    num_classes = 16
    params = init_params(kp_key, C, num_classes)
    feat = jax.random.normal(kf, (B, C, H, W), dtype=jnp.float32)

    kernel_params = prepare_params(params, num_classes)       # one-time, outside jit
    glem_forward = build_glem_forward(kernel_params)

    out = jax.block_until_ready(glem_forward(feat))
    ref = reference_forward(feat, params)
    assert out.shape == (B, num_classes)
    # bf16 MXU operands (f32 accumulation) => relaxed tolerance vs the f32 reference.
    np.testing.assert_allclose(np.asarray(out), np.asarray(ref), rtol=2e-2, atol=2e-2)
    print("KERNEL_OK")
</pallas_src>

<mosaic_0001>
module attributes {stable_mosaic.version = 11 : i64} {
  func.func @_glem_fused_kernel(%arg0: i32, %arg1: memref<16x64xf32, #tpu.memory_space<vmem>>, %arg2: memref<64x32xbf16, #tpu.memory_space<vmem>>, %arg3: memref<1x32xf32, #tpu.memory_space<vmem>>, %arg4: memref<32x64xbf16, #tpu.memory_space<vmem>>, %arg5: memref<1x64xf32, #tpu.memory_space<vmem>>, %arg6: memref<64x64xbf16, #tpu.memory_space<vmem>>, %arg7: memref<1x64xf32, #tpu.memory_space<vmem>>, %arg8: memref<64x64xbf16, #tpu.memory_space<vmem>>, %arg9: memref<1x64xf32, #tpu.memory_space<vmem>>, %arg10: memref<64x128xbf16, #tpu.memory_space<vmem>>, %arg11: memref<1x128xf32, #tpu.memory_space<vmem>>, %arg12: memref<16x128xf32, #tpu.memory_space<vmem>>) attributes {dimension_semantics = [#tpu.dimension_semantics<parallel>], iteration_bounds = array<i64: 1>, scalar_prefetch = 0 : i64, scratch_operands = 0 : i64, tpu.core_type = #tpu.core_type<tc>, window_params = [{transform_indices = @transform_0, window_bounds = array<i64: 16, 64>}, {pipeline_mode = #tpu.pipeline_mode<synchronous>, transform_indices = @transform_1, window_bounds = array<i64: 64, 32>}, {pipeline_mode = #tpu.pipeline_mode<synchronous>, transform_indices = @transform_2, window_bounds = array<i64: 1, 32>}, {pipeline_mode = #tpu.pipeline_mode<synchronous>, transform_indices = @transform_3, window_bounds = array<i64: 32, 64>}, {pipeline_mode = #tpu.pipeline_mode<synchronous>, transform_indices = @transform_4, window_bounds = array<i64: 1, 64>}, {pipeline_mode = #tpu.pipeline_mode<synchronous>, transform_indices = @transform_5, window_bounds = array<i64: 64, 64>}, {pipeline_mode = #tpu.pipeline_mode<synchronous>, transform_indices = @transform_6, window_bounds = array<i64: 1, 64>}, {pipeline_mode = #tpu.pipeline_mode<synchronous>, transform_indices = @transform_7, window_bounds = array<i64: 64, 64>}, {pipeline_mode = #tpu.pipeline_mode<synchronous>, transform_indices = @transform_8, window_bounds = array<i64: 1, 64>}, {pipeline_mode = #tpu.pipeline_mode<synchronous>, transform_indices = @transform_9, window_bounds = array<i64: 64, 128>}, {pipeline_mode = #tpu.pipeline_mode<synchronous>, transform_indices = @transform_10, window_bounds = array<i64: 1, 128>}, {transform_indices = @transform_11, window_bounds = array<i64: 16, 128>}]} {
    %c0 = arith.constant 0 : index
    %c0_0 = arith.constant 0 : index
    %0 = vector.load %arg1[%c0, %c0_0] : memref<16x64xf32, #tpu.memory_space<vmem>>, vector<16x64xf32>
    %1 = arith.truncf %0 : vector<16x64xf32> to vector<16x64xbf16>
    %c0_1 = arith.constant 0 : index
    %c0_2 = arith.constant 0 : index
    %2 = vector.load %arg2[%c0_1, %c0_2] : memref<64x32xbf16, #tpu.memory_space<vmem>>, vector<64x32xbf16>
    %cst = arith.constant dense<0.000000e+00> : vector<16x32xf32>
    %3 = tpu.matmul %1, %2, %cst {dimension_numbers = #tpu.dot_dimension_numbers<[1], [0], [0], [1], [0, 0, 1, 1], [], []>} : vector<16x64xbf16>, vector<64x32xbf16>, vector<16x32xf32> -> vector<16x32xf32>
    %c0_3 = arith.constant 0 : index
    %c0_4 = arith.constant 0 : index
    %4 = vector.load %arg3[%c0_3, %c0_4] : memref<1x32xf32, #tpu.memory_space<vmem>>, vector<1x32xf32>
    %5 = vector.broadcast %4 : vector<1x32xf32> to vector<16x32xf32>
    %6 = arith.addf %3, %5 : vector<16x32xf32>
    %7 = arith.truncf %6 : vector<16x32xf32> to vector<16x32xbf16>
    %c0_5 = arith.constant 0 : index
    %c0_6 = arith.constant 0 : index
    %8 = vector.load %arg4[%c0_5, %c0_6] : memref<32x64xbf16, #tpu.memory_space<vmem>>, vector<32x64xbf16>
    %cst_7 = arith.constant dense<0.000000e+00> : vector<16x64xf32>
    %9 = tpu.matmul %7, %8, %cst_7 {dimension_numbers = #tpu.dot_dimension_numbers<[1], [0], [0], [1], [0, 0, 1, 1], [], []>} : vector<16x32xbf16>, vector<32x64xbf16>, vector<16x64xf32> -> vector<16x64xf32>
    %c0_8 = arith.constant 0 : index
    %c0_9 = arith.constant 0 : index
    %10 = vector.load %arg5[%c0_8, %c0_9] : memref<1x64xf32, #tpu.memory_space<vmem>>, vector<1x64xf32>
    %11 = vector.broadcast %10 : vector<1x64xf32> to vector<16x64xf32>
    %12 = arith.addf %9, %11 : vector<16x64xf32>
    %13 = arith.addf %12, %0 : vector<16x64xf32>
    %14 = arith.truncf %13 : vector<16x64xf32> to vector<16x64xbf16>
    %c0_10 = arith.constant 0 : index
    %c0_11 = arith.constant 0 : index
    %15 = vector.load %arg6[%c0_10, %c0_11] : memref<64x64xbf16, #tpu.memory_space<vmem>>, vector<64x64xbf16>
    %cst_12 = arith.constant dense<0.000000e+00> : vector<16x64xf32>
    %16 = tpu.matmul %14, %15, %cst_12 {dimension_numbers = #tpu.dot_dimension_numbers<[1], [0], [0], [1], [0, 0, 1, 1], [], []>} : vector<16x64xbf16>, vector<64x64xbf16>, vector<16x64xf32> -> vector<16x64xf32>
    %c0_13 = arith.constant 0 : index
    %c0_14 = arith.constant 0 : index
    %17 = vector.load %arg7[%c0_13, %c0_14] : memref<1x64xf32, #tpu.memory_space<vmem>>, vector<1x64xf32>
    %18 = vector.broadcast %17 : vector<1x64xf32> to vector<16x64xf32>
    %19 = arith.addf %16, %18 : vector<16x64xf32>
    %cst_15 = arith.constant 0.000000e+00 : f32
    %20 = vector.broadcast %cst_15 : f32 to vector<16x64xf32>
    %21 = arith.maximumf %19, %20 : vector<16x64xf32>
    %22 = arith.truncf %21 : vector<16x64xf32> to vector<16x64xbf16>
    %c0_16 = arith.constant 0 : index
    %c0_17 = arith.constant 0 : index
    %23 = vector.load %arg8[%c0_16, %c0_17] : memref<64x64xbf16, #tpu.memory_space<vmem>>, vector<64x64xbf16>
    %cst_18 = arith.constant dense<0.000000e+00> : vector<16x64xf32>
    %24 = tpu.matmul %22, %23, %cst_18 {dimension_numbers = #tpu.dot_dimension_numbers<[1], [0], [0], [1], [0, 0, 1, 1], [], []>} : vector<16x64xbf16>, vector<64x64xbf16>, vector<16x64xf32> -> vector<16x64xf32>
    %c0_19 = arith.constant 0 : index
    %c0_20 = arith.constant 0 : index
    %25 = vector.load %arg9[%c0_19, %c0_20] : memref<1x64xf32, #tpu.memory_space<vmem>>, vector<1x64xf32>
    %26 = vector.broadcast %25 : vector<1x64xf32> to vector<16x64xf32>
    %27 = arith.addf %24, %26 : vector<16x64xf32>
    %cst_21 = arith.constant 0.000000e+00 : f32
    %28 = vector.broadcast %cst_21 : f32 to vector<16x64xf32>
    %29 = arith.maximumf %27, %28 : vector<16x64xf32>
    %30 = arith.truncf %29 : vector<16x64xf32> to vector<16x64xbf16>
    %c0_22 = arith.constant 0 : index
    %c0_23 = arith.constant 0 : index
    %31 = vector.load %arg10[%c0_22, %c0_23] : memref<64x128xbf16, #tpu.memory_space<vmem>>, vector<64x128xbf16>
    %cst_24 = arith.constant dense<0.000000e+00> : vector<16x128xf32>
    %32 = tpu.matmul %30, %31, %cst_24 {dimension_numbers = #tpu.dot_dimension_numbers<[1], [0], [0], [1], [0, 0, 1, 1], [], []>} : vector<16x64xbf16>, vector<64x128xbf16>, vector<16x128xf32> -> vector<16x128xf32>
    %c0_25 = arith.constant 0 : index
    %c0_26 = arith.constant 0 : index
    %33 = vector.load %arg11[%c0_25, %c0_26] : memref<1x128xf32, #tpu.memory_space<vmem>>, vector<1x128xf32>
    %34 = vector.broadcast %33 : vector<1x128xf32> to vector<16x128xf32>
    %35 = arith.addf %32, %34 : vector<16x128xf32>
    %c0_27 = arith.constant 0 : index
    %c0_28 = arith.constant 0 : index
    %36 = vector.load %arg12[%c0_27, %c0_28] : memref<16x128xf32, #tpu.memory_space<vmem>>, vector<16x128xf32>
    tpu.vector_store %arg12[%c0_27, %c0_28], %35 {strides = array<i32>} : memref<16x128xf32, #tpu.memory_space<vmem>>, vector<16x128xf32>,
    return
  }
  func.func @transform_0(%arg0: i32) -> (i32, i32) {
    %c0_i32 = arith.constant 0 : i32
    %c0_i32_0 = arith.constant 0 : i32
    return %arg0, %c0_i32 : i32, i32
  }
  func.func @transform_1(%arg0: i32) -> (i32, i32) {
    %c0_i32 = arith.constant 0 : i32
    %c0_i32_0 = arith.constant 0 : i32
    %c0_i32_1 = arith.constant 0 : i32
    return %c0_i32, %c0_i32_0 : i32, i32
  }
  func.func @transform_2(%arg0: i32) -> (i32, i32) {
    %c0_i32 = arith.constant 0 : i32
    %c0_i32_0 = arith.constant 0 : i32
    %c0_i32_1 = arith.constant 0 : i32
    return %c0_i32, %c0_i32_0 : i32, i32
  }
  func.func @transform_3(%arg0: i32) -> (i32, i32) {
    %c0_i32 = arith.constant 0 : i32
    %c0_i32_0 = arith.constant 0 : i32
    %c0_i32_1 = arith.constant 0 : i32
    return %c0_i32, %c0_i32_0 : i32, i32
  }
  func.func @transform_4(%arg0: i32) -> (i32, i32) {
    %c0_i32 = arith.constant 0 : i32
    %c0_i32_0 = arith.constant 0 : i32
    %c0_i32_1 = arith.constant 0 : i32
    return %c0_i32, %c0_i32_0 : i32, i32
  }
  func.func @transform_5(%arg0: i32) -> (i32, i32) {
    %c0_i32 = arith.constant 0 : i32
    %c0_i32_0 = arith.constant 0 : i32
    %c0_i32_1 = arith.constant 0 : i32
    return %c0_i32, %c0_i32_0 : i32, i32
  }
  func.func @transform_6(%arg0: i32) -> (i32, i32) {
    %c0_i32 = arith.constant 0 : i32
    %c0_i32_0 = arith.constant 0 : i32
    %c0_i32_1 = arith.constant 0 : i32
    return %c0_i32, %c0_i32_0 : i32, i32
  }
  func.func @transform_7(%arg0: i32) -> (i32, i32) {
    %c0_i32 = arith.constant 0 : i32
    %c0_i32_0 = arith.constant 0 : i32
    %c0_i32_1 = arith.constant 0 : i32
    return %c0_i32, %c0_i32_0 : i32, i32
  }
  func.func @transform_8(%arg0: i32) -> (i32, i32) {
    %c0_i32 = arith.constant 0 : i32
    %c0_i32_0 = arith.constant 0 : i32
    %c0_i32_1 = arith.constant 0 : i32
    return %c0_i32, %c0_i32_0 : i32, i32
  }
  func.func @transform_9(%arg0: i32) -> (i32, i32) {
    %c0_i32 = arith.constant 0 : i32
    %c0_i32_0 = arith.constant 0 : i32
    %c0_i32_1 = arith.constant 0 : i32
    return %c0_i32, %c0_i32_0 : i32, i32
  }
  func.func @transform_10(%arg0: i32) -> (i32, i32) {
    %c0_i32 = arith.constant 0 : i32
    %c0_i32_0 = arith.constant 0 : i32
    %c0_i32_1 = arith.constant 0 : i32
    return %c0_i32, %c0_i32_0 : i32, i32
  }
  func.func @transform_11(%arg0: i32) -> (i32, i32) {
    %c0_i32 = arith.constant 0 : i32
    %c0_i32_0 = arith.constant 0 : i32
    return %arg0, %c0_i32 : i32, i32
  }
}

</mosaic_0001>

<bundles_post_ra>
// kernel: _fwd.1
= control target key start
LH: loop header
LB: loop body
LE: loop exit
PB: predicated region body
PF: predicated region fallthrough
CT: control target
= control target key end

     0   :  { %16 = vsyncpa [#allocation3], 0  ;;  %s636_s0 = inlined_call_operand.vmem [shape: f32[16,64], index: 0, kind: input, shape index: {}]   ;;  %s637_s1 = inlined_call_operand.vmem [shape: bf16[64,32], index: 1, kind: input, shape index: {}]   ;;  %s638_s2 = inlined_call_operand.vmem [shape: f32[1,32], index: 2, kind: input, shape index: {}]   ;;  %s639_s3 = inlined_call_operand.hbm [shape: bf16[32,64], index: 3, kind: input, shape index: {}]   ;;  %s640_s4 = inlined_call_operand.vmem [shape: f32[1,64], index: 4, kind: input, shape index: {}]   ;;  %s641_s5 = inlined_call_operand.vmem [shape: bf16[64,64], index: 5, kind: input, shape index: {}]   ;;  %s642_s6 = inlined_call_operand.vmem [shape: f32[1,64], index: 6, kind: input, shape index: {}]   ;;  %s643_s7 = inlined_call_operand.vmem [shape: bf16[64,64], index: 7, kind: input, shape index: {}]   ;;  %s644_s8 = inlined_call_operand.vmem [shape: f32[1,64], index: 8, kind: input, shape index: {}]   ;;  %s645_s9 = inlined_call_operand.hbm [shape: bf16[64,128], index: 9, kind: input, shape index: {}]   ;;  %s646_s10 = inlined_call_operand.vmem [shape: f32[1,128], index: 10, kind: input, shape index: {}]   ;;  %s647_s11 = inlined_call_operand.vmem [shape: f32[16,128], index: 11, kind: output, shape index: {}]  }
   0x1   :  { %s28_s19 = sshll.u32 %s639_s3, 4  ;;  %s29_s19 = int_to_ptr.hbm [resolvable:$true] %s28_s19 }
   0x2   :  { %17 = vsyncpa [#allocation5], 0  ;;  %s499_s20 = smov [#allocation2]   ;;  %s51_s24 = sshll.u32 %s645_s9, 4  ;;  %s52_s24 = int_to_ptr.hbm [resolvable:$true] %s51_s24 }
   0x3   :  { %s30_s21 = sshll.u32 %s499_s20, 4  ;;  %s500_s25 = smov 64   ;;  %s31_s21 = int_to_ptr.vmem [resolvable:$true] %s30_s21 }
   0x4   :  { %s501_s26 = smov 4   ;;  %s502_s27 = smov [#allocation4]  }
   0x5   :  { %36 = dma.hbm_to_vmem [thread:$0]  %s29_s19, 256, %s31_s21, [#allocation3], %s500_s25, %s500_s25, %s501_s26  }
   0x6   :  { %s53_s28 = sshll.u32 %s502_s27, 4  ;;  %s54_s28 = int_to_ptr.vmem [resolvable:$true] %s53_s28 }
   0x7   :  { %59 = dma.hbm_to_vmem [thread:$0]  %s52_s24, 512, %s54_s28, [#allocation5], %s500_s25, %s500_s25, %s501_s26  }
   0x8   :  { %495 = dma.done.wait [#allocation3], 256  }
   0x9   :  { %496 = vsyncadd [#allocation3], 4294967040 }
   0xa   :  { %497 = dma.done.wait [#allocation5], 512  }
   0xb   :  { %498 = vsyncadd [#allocation5], 4294966784  ;;  %v423_v0 = vld [vmem:[%s637_s1 + $0x18] sm:$0xff]  ;;  %v422_v1 = vld [vmem:[%s637_s1 + $0x10] sm:$0xff]  ;;  %vm110_vm0 = vcmask 523264   ;;  %vm149_vm1 = vcmask 261120  }
   0xc   :  { %118 = vmatpush.bf16.msra.mxu0 %v423_v0  ;;  %v421_v2 = vld [vmem:[%s637_s1 + $0x8] sm:$0xff]  ;;  %v420_v3 = vld [vmem:[%s637_s1] sm:$0xff]  ;;  %v429_v15 = vld [vmem:[%s641_s5 + $0x18] sm:$0xff] }
   0xd   :  { %v71_v4 = vld [vmem:[%s636_s0] sm:$0xff]  ;;  %v72_v5 = vld [vmem:[%s636_s0 + $0x8] sm:$0xff]  ;;  %213 = vmatpush.bf16.msra.mxu2 %v429_v15  ;;  %v428_v16 = vld [vmem:[%s641_s5 + $0x10] sm:$0xff] }
   0xe   :  { %v73_v6 = vpack.c.bf16 %v72_v5, %v71_v4  ;;  %v425_v7 = vld [vmem:[#allocation2 + $0x8] sm:$0xff]  ;;  %v424_v8 = vld [vmem:[#allocation2] sm:$0xff]  ;;  %v433_v27 = vld [vmem:[%s643_s7 + $0x18] sm:$0xff] }
   0xf   :  { %159 = vmatpush.bf16.msra.mxu1 %v425_v7  ;;  %v442_v10 = vld [vmem:[%s638_s2] ss:$0 sm:$0xff]  ;;  %v427_v17 = vld [vmem:[%s641_s5 + $0x8] sm:$0xff]  ;;  %269 = vmatpush.bf16.msra.mxu3 %v433_v27  ;;  %v432_v28 = vld [vmem:[%s643_s7 + $0x10] sm:$0xff] }
  0x10   :  { %119 = vmatpush.bf16.msra.mxu0 %v422_v1  ;;  %v426_v18 = vld [vmem:[%s641_s5] sm:$0xff]  ;;  %v431_v29 = vld [vmem:[%s643_s7 + $0x8] sm:$0xff]  ;;  %v435_v41 = vld [vmem:[#allocation4 + $0x8] sm:$0xff] }
  0x11   :  { %214 = vmatpush.bf16.msra.mxu2 %v428_v16  ;;  %v443_v20 = vld [vmem:[%s640_s4] ss:$0 sm:$0xff]  ;;  %v437_v31 = vld [vmem:[#allocation4 + $0x18] sm:$0xff]  ;;  %v434_v42 = vld [vmem:[#allocation4] sm:$0xff] }
  0x12   :  { %v430_v30 = vld [vmem:[%s643_s7] sm:$0xff] }
  0x13   :  { %160 = vmatpush.bf16.msra.mxu1 %v424_v8  ;;  %270 = vmatpush.bf16.msra.mxu3 %v432_v28  ;;  %v444_v33 = vld [vmem:[%s642_s6] ss:$0 sm:$0xff] }
  0x14   :  { %120 = vmatpush.bf16.msra.mxu0 %v421_v2  ;;  %v436_v40 = vld [vmem:[#allocation4 + $0x10] sm:$0xff] }
  0x15   :  { %215 = vmatpush.bf16.msra.mxu2 %v427_v17  ;;  %v445_v44 = vld [vmem:[%s644_s8] ss:$0 sm:$0xff] }
  0x16   :  { %v446_v51 = vld [vmem:[%s646_s10] ss:$0 sm:$0xff] }
  0x17   :  { %271 = vmatpush.bf16.msra.mxu3 %v431_v29  ;;  %325 = vmatpush.bf16.msrb.mxu1 %v437_v31 }
  0x18   :  { %121 = vmatpush.bf16.msra.mxu0 %v420_v3 }
  0x19   :  { %216 = vmatpush.bf16.msra.mxu2 %v426_v18 }
  0x1b   :  { %359 = vmatmul.msk.bf16.vlgmr.msra.gmra.mxu0 %vm110_vm0, %v73_v6  ;;  %272 = vmatpush.bf16.msra.mxu3 %v430_v30 }
  0x1c   :  { %326 = vmatpush.bf16.msrb.mxu1 %v436_v40 }
  0x20   :  { %327 = vmatpush.bf16.msrb.mxu1 %v435_v41 }
  0x24   :  { %328 = vmatpush.bf16.msrb.mxu1 %v434_v42 }
  0x98   :  { %v123_v9 = vpop.f32.mrf.mxu0 }
  0x99   :  { %v124_v12 = vadd.f32 %v442_v10, %v123_v9 }
  0xa0   :  { %v125_v11 = vpop.f32.mrf.mxu0 }
  0xa1   :  { %v126_v13 = vadd.f32 %v442_v10, %v125_v11 }
  0xa3   :  { %v128_v14 = vpack.c.bf16 %v126_v13, %v124_v12 }
  0xa5   :  { %368 = vmatmul.msk.bf16.vlgmr.msra.gmra.mxu1 %vm149_vm1, %v128_v14 }
 0x122   :  { %v162_v19 = vpop.f32.mrf.mxu1 }
 0x123   :  { %v163_v21 = vadd.f32 %v443_v20, %v162_v19 }
 0x125   :  { %v167_v24 = vadd.f32 %v163_v21, %v71_v4 }
 0x12a   :  { %v164_v22 = vpop.f32.mrf.mxu1 }
 0x12b   :  { %v165_v23 = vadd.f32 %v443_v20, %v164_v22 }
 0x12d   :  { %v168_v25 = vadd.f32 %v165_v23, %v72_v5 }
 0x12f   :  { %v169_v26 = vpack.c.bf16 %v168_v25, %v167_v24 }
 0x131   :  { %385 = vmatmul.msk.bf16.vlgmr.msra.gmra.mxu2 %vm110_vm0, %v169_v26 }
 0x1b4   :  { %v218_v32 = vpop.f32.mrf.mxu2 }
 0x1b5   :  { %v219_v34 = vadd.f32 %v444_v33, %v218_v32 }
 0x1b7   :  { %v223_v37 = vmax.f32 %v219_v34, 0.0 }
 0x1bc   :  { %v220_v35 = vpop.f32.mrf.mxu2 }
 0x1bd   :  { %v221_v36 = vadd.f32 %v444_v33, %v220_v35 }
 0x1bf   :  { %v224_v38 = vmax.f32 %v221_v36, 0.0 }
 0x1c1   :  { %v225_v39 = vpack.c.bf16 %v224_v38, %v223_v37 }
 0x1c3   :  { %402 = vmatmul.msk.bf16.vlgmr.msra.gmra.mxu3 %vm110_vm0, %v225_v39 }
 0x246   :  { %v274_v43 = vpop.f32.mrf.mxu3 }
 0x247   :  { %v275_v45 = vadd.f32 %v445_v44, %v274_v43 }
 0x249   :  { %v279_v48 = vmax.f32 %v275_v45, 0.0 }
 0x24e   :  { %v276_v46 = vpop.f32.mrf.mxu3 }
 0x24f   :  { %v277_v47 = vadd.f32 %v445_v44, %v276_v46 }
 0x251   :  { %v280_v49 = vmax.f32 %v277_v47, 0.0 }
 0x253   :  { %v281_v50 = vpack.c.bf16 %v280_v49, %v279_v48 }
 0x255   :  { %419 = vmatmul.msk.bf16.vlgmr.msrb.gmra.mxu1 %vm110_vm0, %v281_v50 }
 0x2d2   :  { %v330_v52 = vpop.f32.mrf.mxu1 }
 0x2d3   :  { %v331_v53 = vadd.f32 %v446_v51, %v330_v52 }
 0x2d5   :  { %335 = vst [vmem:[%s647_s11] sm:$0xff] %v331_v53 }
 0x2da   :  { %v332_v54 = vpop.f32.mrf.mxu1 }
 0x2db   :  { %v333_v55 = vadd.f32 %v446_v51, %v332_v54 }
 0x2dd   :  { %336 = vst [vmem:[%s647_s11 + $0x8] sm:$0xff] %v333_v55 }
 0x2de   :  { %341 = vsyncpa [#allocation3], 1 }
 0x2df   :  { %342 = vsyncpa [#allocation5], 1 }

</bundles_post_ra>
